<compile_context>
chip_gen: v7x
topology: tpu7x:2x2x1
jax: 0.10.0
libtpu: 0.0.40
codegen_flags: <defaults>
</compile_context>

<pallas_src>
import jax
import jax.numpy as jnp
from jax.experimental import pallas as pl
from jax.experimental.pallas import tpu as pltpu


def _patch_matmul_bias_relu_kernel(xp_ref, w_ref, b_ref, o_ref):
    # xp_ref: (1, K, tile_p)  bf16  im2col patches, K = Cin*s*s, lanes = patches
    # w_ref : (Cout, K)       bf16  weights (resident across the whole grid)
    # b_ref : (Cout, 1)       f32
    # o_ref : (1, Cout, tile_p)     output tile, lane-dense along spatial axis
    acc = jnp.dot(w_ref[...], xp_ref[0],
                  preferred_element_type=jnp.float32)      # (Cout, tile_p), MXU
    acc = acc + b_ref[...]                                  # single VPU broadcast-add
    acc = jnp.maximum(acc, 0.0)                             # ReLU on f32 accumulator
    o_ref[0] = acc.astype(o_ref.dtype)


def _pick_tile_p(P, K, itemsize, budget_bytes=4 << 20):
    """Largest lane tile that divides P, is a multiple of 128 (dense stores),
    and keeps the double-buffered patch slab well inside the default scoped
    VMEM limits of all TPU generations."""
    if P % 128 != 0:
        return P  # tiny spatial extent: one full-extent block per batch element
    for t in (4096, 2048, 1024, 512, 256, 128):
        if P % t == 0 and K * t * itemsize <= budget_bytes:
            return t
    return 128


def downsample_conv_relu(x_nchw, w2, b, stride,
                         out_dtype=jnp.float32, compute_dtype=jnp.bfloat16):
    """Conv2d(kernel_size=stride, stride=stride, padding=0) + bias + ReLU.

    x_nchw: (N, Cin, H, W)
    w2    : (Cout, Cin*stride*stride)   weight pre-flattened in (c, dy, dx) order
    b     : (Cout,)
    returns (N, Cout, H//stride, W//stride) in out_dtype
    """
    N, Cin, H, W = x_nchw.shape
    s = int(stride)
    Ho, Wo = H // s, W // s
    # PyTorch drops any remainder rows/cols when H or W is not divisible.
    x_nchw = x_nchw[:, :, :Ho * s, :Wo * s]

    P = Ho * Wo
    K = Cin * s * s
    Cout = w2.shape[0]

    # im2col for the non-overlapping case: pure reshape + transpose, one pass,
    # no halo / padding needed.  k index = c*(s*s) + dy*s + dx  (matches the
    # PyTorch OIHW weight flattening done once at init).
    xp = x_nchw.reshape(N, Cin, Ho, s, Wo, s)
    xp = jnp.transpose(xp, (0, 1, 3, 5, 2, 4))          # (N, Cin, dy, dx, Ho, Wo)
    xp = xp.reshape(N, K, P).astype(compute_dtype)      # bf16 halves HBM/VMEM bytes

    wk = w2.astype(compute_dtype)                        # (Cout, K), cast is no-op if
    b2 = b.reshape(Cout, 1).astype(jnp.float32)          # already bf16 from init

    tile_p = _pick_tile_p(P, K, jnp.dtype(compute_dtype).itemsize)
    grid = (N, P // tile_p)

    out = pl.pallas_call(
        _patch_matmul_bias_relu_kernel,
        out_shape=jax.ShapeDtypeStruct((N, Cout, P), out_dtype),
        grid=grid,
        in_specs=[
            pl.BlockSpec((1, K, tile_p), lambda n, p: (n, 0, p)),
            pl.BlockSpec((Cout, K), lambda n, p: (0, 0)),
            pl.BlockSpec((Cout, 1), lambda n, p: (0, 0)),
        ],
        out_specs=pl.BlockSpec((1, Cout, tile_p), lambda n, p: (n, 0, p)),
        compiler_params=pltpu.CompilerParams(
            dimension_semantics=("parallel", "parallel"),
        ),
    )(xp, wk, b2)

    # (N, Cout, Ho*Wo) -> (N, Cout, Ho, Wo): trailing-dim split, no data movement.
    return out.reshape(N, Cout, Ho, Wo)


class DownsamplingConvBlockPallas:
    """Mirror of the PyTorch DownsamplingConvBlock with normalization='none'."""

    def __init__(self, n_filters_in, n_filters_out, stride=2,
                 normalization='none', key=None):
        assert normalization == 'none', (
            "only normalization='none' (the default) is implemented")
        # TODO(synk): batchnorm/groupnorm/instancenorm variants not implemented.
        if key is None:
            key = jax.random.PRNGKey(0)
        kw, kb = jax.random.split(key)
        k = int(stride)
        fan_in = n_filters_in * k * k
        bound = 1.0 / (fan_in ** 0.5)
        # PyTorch Conv2d default init: U(-1/sqrt(fan_in), 1/sqrt(fan_in)),
        # weight stored in PyTorch layout (Cout, Cin, k, k).
        self.w = jax.random.uniform(kw, (n_filters_out, n_filters_in, k, k),
                                    jnp.float32, -bound, bound)
        self.b = jax.random.uniform(kb, (n_filters_out,), jnp.float32,
                                    -bound, bound)
        self.stride = k
        # Flatten + cast the weight ONCE at init (OIHW -> (Cout, Cin*k*k),
        # which matches the im2col (c, dy, dx) contraction ordering).
        self.w2_bf16 = self.w.reshape(n_filters_out, fan_in).astype(jnp.bfloat16)

    def __call__(self, x_nchw):
        return downsample_conv_relu(x_nchw, self.w2_bf16, self.b, self.stride)


def _reference_forward(x_nchw, w, b, stride):
    """Pure-JAX reference (lax conv) with the same bf16-input / f32-accumulate
    numerics as the Pallas kernel."""
    y = jax.lax.conv_general_dilated(
        x_nchw.astype(jnp.bfloat16), w.astype(jnp.bfloat16),
        window_strides=(stride, stride), padding='VALID',
        dimension_numbers=('NCHW', 'OIHW', 'NCHW'),
        preferred_element_type=jnp.float32)
    y = y + b[None, :, None, None]
    return jnp.maximum(y, 0.0)


if __name__ == "__main__":
    key = jax.random.PRNGKey(0)
    kx, kp = jax.random.split(key)

    N, Cin, H, W = 2, 4, 16, 16
    n_filters_out, stride = 8, 2

    x = jax.random.normal(kx, (N, Cin, H, W), jnp.float32)

    block = DownsamplingConvBlockPallas(Cin, n_filters_out, stride=stride,
                                        normalization='none', key=kp)

    out = jax.block_until_ready(block(x))

    ref = _reference_forward(x, block.w, block.b, stride)
    assert out.shape == (N, n_filters_out, H // stride, W // stride), out.shape
    max_err = float(jnp.max(jnp.abs(out - ref)))
    assert jnp.allclose(out, ref, atol=1e-3, rtol=1e-3), max_err

    print("KERNEL_OK")
</pallas_src>

<mosaic_0001>
module attributes {stable_mosaic.version = 11 : i64} {
  func.func @_patch_matmul_bias_relu_kernel(%arg0: i32, %arg1: i32, %arg2: memref<1x16x64xbf16, #tpu.memory_space<vmem>>, %arg3: memref<8x16xbf16, #tpu.memory_space<vmem>>, %arg4: memref<8x1xf32, #tpu.memory_space<vmem>>, %arg5: memref<1x8x64xf32, #tpu.memory_space<vmem>>) attributes {dimension_semantics = [#tpu.dimension_semantics<parallel>, #tpu.dimension_semantics<parallel>], iteration_bounds = array<i64: 2, 1>, scalar_prefetch = 0 : i64, scratch_operands = 0 : i64, tpu.core_type = #tpu.core_type<tc>, window_params = [{transform_indices = @transform_0, window_bounds = array<i64: 1, 16, 64>}, {pipeline_mode = #tpu.pipeline_mode<synchronous>, transform_indices = @transform_1, window_bounds = array<i64: 8, 16>}, {pipeline_mode = #tpu.pipeline_mode<synchronous>, transform_indices = @transform_2, window_bounds = array<i64: 8, 1>}, {transform_indices = @transform_3, window_bounds = array<i64: 1, 8, 64>}]} {
    %c0 = arith.constant 0 : index
    %c0_0 = arith.constant 0 : index
    %0 = vector.load %arg3[%c0, %c0_0] : memref<8x16xbf16, #tpu.memory_space<vmem>>, vector<8x16xbf16>
    %c0_1 = arith.constant 0 : index
    %c0_2 = arith.constant 0 : index
    %c0_3 = arith.constant 0 : index
    %1 = vector.load %arg2[%c0_1, %c0_2, %c0_3] : memref<1x16x64xbf16, #tpu.memory_space<vmem>>, vector<1x16x64xbf16>
    %2 = vector.shape_cast %1 : vector<1x16x64xbf16> to vector<16x64xbf16>
    %cst = arith.constant dense<0.000000e+00> : vector<8x64xf32>
    %3 = tpu.matmul %0, %2, %cst {dimension_numbers = #tpu.dot_dimension_numbers<[1], [0], [0], [1], [0, 0, 1, 1], [], []>} : vector<8x16xbf16>, vector<16x64xbf16>, vector<8x64xf32> -> vector<8x64xf32>
    %c0_4 = arith.constant 0 : index
    %c0_5 = arith.constant 0 : index
    %4 = vector.load %arg4[%c0_4, %c0_5] : memref<8x1xf32, #tpu.memory_space<vmem>>, vector<8x1xf32>
    %5 = vector.broadcast %4 : vector<8x1xf32> to vector<8x64xf32>
    %6 = arith.addf %3, %5 : vector<8x64xf32>
    %cst_6 = arith.constant 0.000000e+00 : f32
    %7 = vector.broadcast %cst_6 : f32 to vector<8x64xf32>
    %8 = arith.maximumf %6, %7 : vector<8x64xf32>
    %c0_7 = arith.constant 0 : index
    %c0_8 = arith.constant 0 : index
    %c0_9 = arith.constant 0 : index
    %9 = vector.load %arg5[%c0_7, %c0_8, %c0_9] : memref<1x8x64xf32, #tpu.memory_space<vmem>>, vector<1x8x64xf32>
    %10 = vector.shape_cast %9 : vector<1x8x64xf32> to vector<8x64xf32>
    %11 = vector.shape_cast %8 : vector<8x64xf32> to vector<1x8x64xf32>
    tpu.vector_store %arg5[%c0_7, %c0_8, %c0_9], %11 {strides = array<i32>} : memref<1x8x64xf32, #tpu.memory_space<vmem>>, vector<1x8x64xf32>,
    return
  }
  func.func @transform_0(%arg0: i32, %arg1: i32) -> (i32, i32, i32) {
    %c0_i32 = arith.constant 0 : i32
    %c0_i32_0 = arith.constant 0 : i32
    return %arg0, %c0_i32, %arg1 : i32, i32, i32
  }
  func.func @transform_1(%arg0: i32, %arg1: i32) -> (i32, i32) {
    %c0_i32 = arith.constant 0 : i32
    %c0_i32_0 = arith.constant 0 : i32
    %c0_i32_1 = arith.constant 0 : i32
    return %c0_i32, %c0_i32_0 : i32, i32
  }
  func.func @transform_2(%arg0: i32, %arg1: i32) -> (i32, i32) {
    %c0_i32 = arith.constant 0 : i32
    %c0_i32_0 = arith.constant 0 : i32
    %c0_i32_1 = arith.constant 0 : i32
    return %c0_i32, %c0_i32_0 : i32, i32
  }
  func.func @transform_3(%arg0: i32, %arg1: i32) -> (i32, i32, i32) {
    %c0_i32 = arith.constant 0 : i32
    %c0_i32_0 = arith.constant 0 : i32
    return %arg0, %c0_i32, %arg1 : i32, i32, i32
  }
}

</mosaic_0001>

<bundles_post_ra>
// kernel: tpu_custom_call.1
= control target key start
LH: loop header
LB: loop body
LE: loop exit
PB: predicated region body
PF: predicated region fallthrough
CT: control target
= control target key end

     0   :  { %8 = vsyncpa [#allocation3], 0  ;;  %s779_s0 = inlined_call_operand.hbm [shape: bf16[2,16,64], index: 0, kind: input, shape index: {}]   ;;  %s780_s1 = inlined_call_operand.vmem [shape: bf16[8,16], index: 1, kind: input, shape index: {}]   ;;  %s781_s2 = inlined_call_operand.vmem [shape: f32[8,1], index: 2, kind: input, shape index: {}]   ;;  %s782_s3 = inlined_call_operand.hbm [shape: f32[2,8,64], index: 3, kind: output, shape index: {}]  }
   0x1   :  { %10 = vsyncpa [#allocation3 + $0x1], 0 }
   0x2   :  { %11 = vsyncpa [#allocation4], 0 }
   0x3   :  { %13 = vsyncpa [#allocation4 + $0x1], 0  ;;  %s600_s12 = smov 0   ;;  %s602_s13 = smov 0  }
   0x4   :  { %s604_s14 = smov 0   ;;  %s606_s15 = smov 0  }
   0x5   :  { %s608_s16 = smov 0   ;;  %s610_s17 = smov 0  }
   0x6 LB: > { %s365_s18 = sadd.s32 4294967295, %s571_s17   ;;  %s366_s19 = sadd.s32 4294967294, %s571_s17   ;;  %s571_s17 = sphi %s610_s17, %s19_s17   ;;  %s567_s16 = sphi %s608_s16, %s797_s16   ;;  %s563_s15 = sphi %s606_s15, %s796_s15   ;;  %s559_s14 = sphi %s604_s14, %s795_s14   ;;  %s555_s13 = sphi %s602_s13, %s794_s13   ;;  %s551_s12 = sphi %s600_s12, %s793_s12  }
   0x7   : > { %s31_s20 = sadd.s32 1, %s567_s16  ;;  %s40_s21 = sadd.s32 1, %s559_s14 }
   0x8   : > { %p33_p0 = scmp.ge.s32.totalorder %s31_s20, 2  ;;  %p47_p1 = scmp.ne.s32.totalorder %s559_s14, %s555_s13 }
   0x9   : > { %p48_p2 = scmp.eq.s32.totalorder %s571_s17, 0  ;;  %p53_p3 = scmp.ne.s32.totalorder %s555_s13, %s551_s12 }
   0xa   : > { %s799_s20 = smov (%p33_p0, %s31_s20), 0  ;;  %p54_p5 = scmp.eq.s32.totalorder %s365_s18, 0 }
   0xb   : > { %p641_p4 = por %p48_p2, %p47_p1  ;;  %s35_s23 = ssub.s32 %s567_s16, %s799_s20 }
   0xc   : > { %p121_p6 = scmp.eq.s32.totalorder %s365_s18, 1  ;;  %p38_p7 = scmp.eq.s32.totalorder %s35_s23, 0 }
   0xd   : > { %p647_p8 = por %p54_p5, %p53_p3  ;;  %p127_p10 = scmp.eq.s32.totalorder %s366_s19, 1 }
   0xe   : > { %p651_p9 = por %p121_p6, %p47_p1  ;;  %p402_p13 = scmp.lt.s32.totalorder %s571_s17, 2 }
   0xf   : > { %s656_s26 = scalar_select %p38_p7, %s559_s14, %s40_s21  }
  0x10   : > { %s786_s25 = scalar_select %p651_p9, 1, 0 }
  0x11   : > { %p658_p11 = por %p127_p10, %p53_p3  ;;  %s153_s28 = sand.u32 1, %s559_s14  }
  0x12   : > { %s369_s29 = sshll.u32 %s153_s28, 3  ;;  %s381_s30 = sshll.u32 %s567_s16, 7 }
  0x13   : > { %s787_s27 = scalar_select %p658_p11, 1, 0 }
  0x14   : > { %s669_s6 = scalar_lea.hbm %s779_s0, %s381_s30  ;;  %s157_s7 = scalar_lea.vmem [#allocation2], %s369_s29 }
  0x15   : > { %s165_s8 = sshll.u32 %s157_s7, 4  ;;  %p675_p0 = pnand %p402_p13, %p641_p4  ;;  %s671_s8 = int_to_ptr.vmem [resolvable:$true] %s165_s8 }
  0x16   : > { %s680_s10 = scalar_lea.sflag [#allocation3], %s153_s28  ;;  %s459_s11 = scalar_lea.hbm %s669_s6, 128 }
  0x17   : > { %p460_p2 = scmp.ne.s32.totalorder %s669_s6, %s459_s11  ;;  %p461_p3 = pneg %p675_p0 }
  0x18   : > { %s464_s21 = scalar_lea.hbm %s779_s0, 256  ;;  %p465_p4 = scmp.lt.u32.totalorder %s669_s6, %s779_s0 }
  0x19   : > { %p462_p5 = pnand %p461_p3, %p460_p2  ;;  %p466_p7 = scmp.lt.u32.totalorder %s464_s21, %s459_s11 }
  0x1a   : > { %p468_p13 = scmp.lt.u32.totalorder %s459_s11, %s669_s6 }
  0x1b   : > { %p463_p6 = pneg %p462_p5  ;;  %p467_p10 = por %p466_p7, %p465_p4 }
  0x1d   : > { %p469_p12 = por %p468_p13, %p467_p10 }
  0x1f   : > { %p470_p1 = pnand %p469_p12, %p463_p6 }
  0x21   : > { %473 = shalt.err (!%p470_p1)
}
  0x22   : > { %s474_s28 = scalar_lea.vmem %s671_s8, 128  ;;  %s573_s29 = smov [#allocation2]  }
  0x23   : > { %p475_p2 = scmp.ne.s32.totalorder %s671_s8, %s474_s28  ;;  %s479_s30 = sshll.u32 %s573_s29, 4  ;;  %s480_s30 = int_to_ptr.vmem [resolvable:$false] %s479_s30 }
  0x24   : > { %s481_s4 = scalar_lea.vmem %s480_s30, 256  ;;  %p482_p9 = scmp.lt.s32.totalorder %s671_s8, %s480_s30 }
  0x25   : > { %p477_p5 = pnand %p475_p2, %p461_p3  ;;  %p483_p4 = scmp.lt.s32.totalorder %s481_s4, %s474_s28 }
  0x27   : > { %p478_p11 = pneg %p477_p5  ;;  %p484_p7 = por %p483_p4, %p482_p9 }
  0x29   : > { %p485_p10 = pnand %p484_p7, %p478_p11 }
  0x2b   : > { %488 = shalt.err (!%p485_p10)
}
  0x2c   : > { %s574_s5 = smov 64   ;;  %s575_s7 = smov 4  }
  0x2d   : > { %397 = dma.hbm_to_vmem [thread:$0]  (!%p675_p0), %s669_s6, 128, %s671_s8, %s680_s10, %s574_s5, %s574_s5, %s575_s7  }
  0x2e   : > { %p173_p12 = scmp.lt.s32.totalorder %s571_s17, 3  ;;  %p789_p1 = scmp.ge.s32.totalorder %s571_s17, 1 }
  0x30   : > { %p174_p3 = pnand %p789_p1, %p173_p12 }
  0x31   : > { %s712_s11 = sand.u32 (!%p174_p3), 1, %s555_s13  }
  0x32   : > { %177 = sbr.rel (%p174_p3) target bundleno = 293 (0x125), region = 32  ;;  %s373_s18 = sshll.u32 (!%p174_p3), %s712_s11, 3 }
  0x33   : > { %s180_s19 = scalar_lea.sflag (!%p174_p3), [#allocation3], %s712_s11  ;;  %s183_s21 = scalar_lea.vmem (!%p174_p3), [#allocation2], %s373_s18 }
  0x39   : > { %542 = dma.done.wait (%p647_p8), %s180_s19, 128  }
  0x3a   : > { %544 = vsyncadd (%p647_p8), %s180_s19, 4294967168  ;;  %v576_v0 = vmov 0.0   ;;  %vm577_vm0 = vmmov 0   ;;  %v578_v1 = vmov 0   ;;  %v458_v2 = vld [vmem:[%s183_s21] sm:$0xff]   ;;  %vm222_vm1 = vcmask 130048  }
  0x3b   : > { %384 = vmatprep.subr.bf16.mxu0 %v576_v0  ;;  %386 = vmatprep.mubr.msk.bf16.mxu0 %vm577_vm0, %v576_v0  ;;  %v210_v3 = vld [vmem:[%s781_s2] sm:$0xff]  ;;  %s378_s24 = sshll.u32 %s563_s15, 7  ;;  %s205_s22 = scalar_lea.vmem [#allocation5], %s373_s18  ;;  %vm267_vm2 = vcmask 523264  }
  0x3c   : > { %457 = vset.pattern.permute.xlu0 %v578_v1  ;;  %385 = vmatpush3.bf16.msra.mxu0 %v458_v2  ;;  %v207_v4 = vld [vmem:[%s780_s1] sm:$0xf]  ;;  %s284_s23 = sshll.u32 %s205_s22, 4  ;;  %s730_s30 = scalar_lea.hbm %s782_s3, %s378_s24  ;;  %s732_s23 = int_to_ptr.vmem [resolvable:$true] %s284_s23 }
  0x3d   : > { %213 = vperm.xlu0 %457, %v210_v3   ;;  %s270_s15 = scalar_lea.sflag [#allocation4], %s712_s11  ;;  %s489_s4 = scalar_lea.vmem %s732_s23, 128 }
  0x3e   : > { %p490_p8 = scmp.ne.s32.totalorder %s732_s23, %s489_s4  ;;  %p790_p9 = scmp.ne.s32.totalorder %s786_s25, 0 }
  0x3f   : > { %387 = vmatmul.mubr.msk.bf16.vlgmr.msra.gmra.mrb[0].mxu0 %vm222_vm1, %v207_v4  ;;  %s579_s5 = smov [#allocation5]  }
  0x40   : > { %p491_p11 = pnand %p490_p8, %p790_p9  ;;  %s493_s7 = sshll.u32 %s579_s5, 4  ;;  %s494_s7 = int_to_ptr.vmem [resolvable:$false] %s493_s7 }
  0x41   : > { %s495_s18 = scalar_lea.vmem %s494_s7, 256  ;;  %p496_p6 = scmp.lt.s32.totalorder %s732_s23, %s494_s7 }
  0x42   : > { %p492_p0 = pneg %p491_p11  ;;  %p497_p13 = scmp.lt.s32.totalorder %s495_s18, %s489_s4 }
  0x44   : > { %p498_p2 = por %p497_p13, %p496_p6 }
  0x46   : > { %p499_p5 = pnand %p498_p2, %p492_p0 }
  0xbc   : > { %v214_v5 = vpop.permute.xlu0 %213 }
 0x112   : > { %v260_v6 = vpop.f32.mrb[0].mxu0 }
 0x113   : > { %v261_v7 = vadd.f32 %v260_v6, %v214_v5  ;;  %v388_v8 = vpop.f32.mrb[1].mxu0 }
 0x114   : > { %v263_v9 = vpop.f32.mrb[2].mxu0 }
 0x115   : > { %v266_v10 = vmax.f32 %v261_v7, 0.0  ;;  %v389_v11 = vpop.f32.mrb[3].mxu0 }
 0x117   : > { %268 = vst.msk [vmem:[%s205_s22] sm:$0xff] %vm267_vm2, %v266_v10 }
 0x118   : > { %502 = shalt.err (!%p499_p5)
}
 0x119   : > { %s503_s11 = scalar_lea.hbm %s730_s30, 128  ;;  %s507_s6 = scalar_lea.hbm %s782_s3, 256 }
 0x11a   : > { %p504_p4 = scmp.ne.s32.totalorder %s730_s30, %s503_s11  ;;  %p508_p12 = scmp.lt.u32.totalorder %s730_s30, %s782_s3 }
 0x11b   : > { %p509_p1 = scmp.lt.u32.totalorder %s507_s6, %s503_s11  ;;  %p511_p8 = scmp.lt.u32.totalorder %s503_s11, %s730_s30 }
 0x11c   : > { %p505_p7 = pnand %p504_p4, %p790_p9 }
 0x11d   : > { %p510_p3 = por %p509_p1, %p508_p12 }
 0x11e   : > { %p506_p10 = pneg %p505_p7 }
 0x11f   : > { %p512_p11 = por %p511_p8, %p510_p3 }
 0x121   : > { %p513_p0 = pnand %p512_p11, %p506_p10 }
 0x123   : > { %516 = shalt.err (!%p513_p0)
}
 0x124   : > { %392 = dma.vmem_to_hbm [thread:$0]  (%p790_p9), %s732_s23, 128, %s730_s30, %s270_s15  }
 0x125 PF: > { %s296_s10 = sand.u32 1, %s551_s12   ;;  %p791_p6 = scmp.ne.s32.totalorder %s787_s27, 0 }
 0x126   : > { %p792_p13 = scmp.ge.s32.totalorder %s571_s17, 2  ;;  %s297_s24 = scalar_lea.sflag [#allocation4], %s296_s10 }
 0x128   : > { %p399_p2 = pnand %p792_p13, %p791_p6 }
 0x12a   : > { %546 = dma.done.wait (!%p399_p2), %s297_s24, 128  }
 0x12b   : > { %548 = vsyncadd (!%p399_p2), %s297_s24, 4294967168  ;;  %s19_s17 = sadd.s32 1, %s571_s17   ;;  %s793_s12 = smov %s555_s13 }
 0x12c   : > { %p16_p5 = scmp.ge.s32.totalorder %s19_s17, 4   ;;  %s794_s13 = smov %s559_s14 }
 0x12d   : > { %s795_s14 = smov %s656_s26  ;;  %s796_s15 = smov %s567_s16 }
 0x12e   : > { %s797_s16 = smov %s799_s20  ;;  %18 = sbr.rel (!%p16_p5) target bundleno = 6 (0x6), region = 77 }
 0x135   :  { %302 = vsyncpa [#allocation3], 1 }
 0x136   :  { %304 = vsyncpa [#allocation3 + $0x1], 1 }
 0x137   :  { %305 = vsyncpa [#allocation4], 1 }
 0x138   :  { %307 = vsyncpa [#allocation4 + $0x1], 1 }

</bundles_post_ra>
